<compile_context>
chip_gen: v5e
topology: v5e:2x2
jax: 0.10.0
libtpu: 0.0.40
codegen_flags: <defaults>
</compile_context>

<pallas_src>
import jax
import jax.numpy as jnp
from jax.experimental import pallas as pl
from jax.experimental.pallas import tpu as pltpu

_LANE = 128


def _add_pos_kernel(x_ref, pe_ref, o_ref):
    # x_ref / o_ref: (bB, tC) tile of the flattened (B, S*D) activations
    # pe_ref:        (1, tC)  tile of the flattened positional table
    # Batch broadcast is fused here (free under the HBM-bound add).
    o_ref[...] = x_ref[...] + pe_ref[...]


def _sublane_quantum(itemsize):
    # Native packed-tile sublane count: 8 for 4-byte, 16 for bf16/fp16, 32 for int8/fp8.
    return max(8, 32 // max(1, itemsize))


def _hw_budget():
    """(vmem_limit_bytes, target_block_bytes) tuned per TPU generation."""
    vmem_limit, target = 32 << 20, 2 << 20           # safe on v5e/v6e (and fine on v7x)
    try:
        phys_vmem = pltpu.get_tpu_info().vmem_capacity_bytes
        if phys_vmem <= (64 << 20):                  # v7x: 64 MiB/TC but ~2.3x v6e HBM BW ->
            vmem_limit, target = 40 << 20, 4 << 20   # larger blocks amortize per-step overhead
    except Exception:
        pass                                         # unknown chip -> conservative defaults
    return vmem_limit, target


def _choose_tiles(B, total, itemsize, target_bytes, vmem_limit):
    """Pick (batch_tile, column_tile) for the flattened (B, S*D) layout.

    Mosaic (8,128) rule on the last two block dims:
      * batch tile  : multiple of the dtype sublane quantum, or equal to B
      * column tile : multiple of 128, or equal to S*D
    The pipeline holds 2 x-in + 2 out buffers (plus 2 small pe buffers), so one x
    block must stay under ~1/5 of the scoped-VMEM limit; within that we aim for
    `target_bytes` per block to amortize the ~0.35 us per-grid-step overhead.
    """
    sublane = _sublane_quantum(itemsize)
    block_budget = vmem_limit // 5
    max_block = min(target_bytes, block_budget)

    row_bytes = total * itemsize
    min_bB = B if B <= sublane else sublane

    if min_bB * row_bytes > max_block:
        # Rows too long even at the minimum batch tile: keep bB minimal and split
        # the row into 128-multiple chunks sized to the budget.
        bB = min_bB
        tC = (max_block // (bB * itemsize)) // _LANE * _LANE
        tC = max(_LANE, min(tC, total))
        return bB, tC

    # Whole flattened row fits in one block: keep it lane-dense, tile the batch only.
    tC = total
    bB = max(1, max_block // row_bytes)
    if bB >= B or B <= sublane:
        bB = B
    else:
        # Round to the packed-tile sublane quantum; rounding *up* to `sublane` is safe
        # because we already verified a `sublane`-row block fits the budget above.
        bB = min(B, max(sublane, (bB // sublane) * sublane))
    # Keep >= 2 blocks along the batch axis when B allows it, so both v7x TensorCores
    # get work and the pipeline always has a next block to prefetch.
    if bB >= B and B >= 2 * sublane:
        bB = max(sublane, ((B // 2) // sublane) * sublane)
    return bB, tC


def positional_encoding_forward(x, pos_embed, n, dropout_rate=0.0):
    """x: (B, n+1, D); pos_embed: (1, num_patches+1, D); n is a static Python int."""
    if dropout_rate != 0.0:
        # TODO(synk): non-zero dropout needs grid-invariant in-kernel sampling
        # (pltpu.prng_seed / pltpu.sample_block); module default is 0.0.
        raise NotImplementedError("only dropout_rate == 0.0 (the module default) is supported")

    B, S, D = x.shape
    P = pos_embed.shape[1]
    if S != n + 1:
        raise ValueError(f"x sequence length {S} must equal n + 1 = {n + 1}")
    if n + 1 > P:
        raise ValueError(f"n + 1 = {n + 1} exceeds positional table length {P}")

    # Static slice of the small (1, P, D) table only (never an extra pass over x),
    # pre-cast to x.dtype once so the kernel never DMAs wider pe bytes.
    # NOTE: if pos_embed is f32 and x is bf16 this keeps bf16 output (deliberate
    # deviation from torch's promotion to f32; normally both share the compute dtype).
    pe = pos_embed if S == P else pos_embed[:, :S]
    if pe.dtype != x.dtype:
        pe = pe.astype(x.dtype)

    # Flatten (S, D) -> S*D: lane-dense last dim regardless of d_model; contiguous
    # reshape is metadata-only (no HBM copy).
    total = S * D
    x_flat = x.reshape(B, total)
    pe_flat = pe.reshape(1, total)

    itemsize = jnp.dtype(x.dtype).itemsize
    vmem_limit, target_bytes = _hw_budget()
    bB, tC = _choose_tiles(B, total, itemsize, target_bytes, vmem_limit)

    # Columns on the outer grid axis, batch on the (fast) inner axis: the pe block
    # index (0, j) is constant across consecutive steps, so Pallas skips its re-DMA.
    grid = (pl.cdiv(total, tC), pl.cdiv(B, bB))

    out_flat = pl.pallas_call(
        _add_pos_kernel,
        out_shape=jax.ShapeDtypeStruct((B, total), x.dtype),
        grid_spec=pltpu.PrefetchScalarGridSpec(
            num_scalar_prefetch=0,
            grid=grid,
            in_specs=[
                pl.BlockSpec((bB, tC), lambda j, i: (i, j)),
                pl.BlockSpec((1, tC), lambda j, i: (0, j)),  # constant over the inner axis
            ],
            out_specs=pl.BlockSpec((bB, tC), lambda j, i: (i, j)),
        ),
        # x aliases the output: no kernel-level traffic change, but lets XLA reuse the
        # activation buffer when the caller donates x (XLA inserts a copy otherwise).
        input_output_aliases={0: 0},
        cost_estimate=pl.CostEstimate(
            flops=B * total,
            transcendentals=0,
            bytes_accessed=2 * B * total * itemsize + total * itemsize,
        ),
        compiler_params=pltpu.CompilerParams(
            dimension_semantics=("parallel", "parallel"),
            vmem_limit_bytes=vmem_limit,
        ),
    )(x_flat, pe_flat)

    return out_flat.reshape(B, S, D)


if __name__ == "__main__":
    key = jax.random.PRNGKey(0)
    k_x, k_pe, k_x2, k_pe2 = jax.random.split(key, 4)

    # Case 1: n == num_patches (full positional table used), d_model=32, seq=9, batch=2.
    B, num_patches, d_model = 2, 8, 32
    n = num_patches
    S = n + 1
    pos_embed = jax.random.normal(k_pe, (1, num_patches + 1, d_model), dtype=jnp.float32)
    x = jax.random.normal(k_x, (B, S, d_model), dtype=jnp.float32)

    ref = x + pos_embed[:, : n + 1]          # reference computed before the (aliased) call
    out = jax.block_until_ready(positional_encoding_forward(x, pos_embed, n))
    assert out.shape == (B, S, d_model)
    assert jnp.allclose(out, ref, atol=1e-6), "case 1 mismatch vs reference"

    # Case 2: n + 1 < num_patches + 1 (only a prefix of the positional table used).
    num_patches2, n2 = 16, 8
    S2 = n2 + 1
    pos_embed2 = jax.random.normal(k_pe2, (1, num_patches2 + 1, d_model), dtype=jnp.float32)
    x2 = jax.random.normal(k_x2, (B, S2, d_model), dtype=jnp.float32)

    ref2 = x2 + pos_embed2[:, : n2 + 1]
    out2 = jax.block_until_ready(positional_encoding_forward(x2, pos_embed2, n2))
    assert jnp.allclose(out2, ref2, atol=1e-6), "case 2 mismatch vs reference"

    print("KERNEL_OK")
</pallas_src>

<mosaic_0001>
module attributes {stable_mosaic.version = 11 : i64} {
  func.func @_add_pos_kernel(%arg0: i32, %arg1: i32, %arg2: memref<2x288xf32, #tpu.memory_space<vmem>>, %arg3: memref<1x288xf32, #tpu.memory_space<vmem>>, %arg4: memref<2x288xf32, #tpu.memory_space<vmem>>) attributes {dimension_semantics = [#tpu.dimension_semantics<parallel>, #tpu.dimension_semantics<parallel>], iteration_bounds = array<i64: 1, 1>, scalar_prefetch = 0 : i64, scratch_operands = 0 : i64, tpu.core_type = #tpu.core_type<tc>, window_params = [{transform_indices = @transform_0, window_bounds = array<i64: 2, 288>}, {transform_indices = @transform_1, window_bounds = array<i64: 1, 288>}, {transform_indices = @transform_2, window_bounds = array<i64: 2, 288>}]} {
    %c0 = arith.constant 0 : index
    %c0_0 = arith.constant 0 : index
    %0 = vector.load %arg2[%c0, %c0_0] : memref<2x288xf32, #tpu.memory_space<vmem>>, vector<2x288xf32>
    %c0_1 = arith.constant 0 : index
    %c0_2 = arith.constant 0 : index
    %1 = vector.load %arg3[%c0_1, %c0_2] : memref<1x288xf32, #tpu.memory_space<vmem>>, vector<1x288xf32>
    %2 = vector.broadcast %1 : vector<1x288xf32> to vector<2x288xf32>
    %3 = arith.addf %0, %2 : vector<2x288xf32>
    %c0_3 = arith.constant 0 : index
    %c0_4 = arith.constant 0 : index
    %4 = vector.load %arg4[%c0_3, %c0_4] : memref<2x288xf32, #tpu.memory_space<vmem>>, vector<2x288xf32>
    tpu.vector_store %arg4[%c0_3, %c0_4], %3 {strides = array<i32>} : memref<2x288xf32, #tpu.memory_space<vmem>>, vector<2x288xf32>,
    return
  }
  func.func @transform_0(%arg0: i32, %arg1: i32) -> (i32, i32) {
    %c0_i32 = arith.constant 0 : i32
    return %arg1, %arg0 : i32, i32
  }
  func.func @transform_1(%arg0: i32, %arg1: i32) -> (i32, i32) {
    %c0_i32 = arith.constant 0 : i32
    %c0_i32_0 = arith.constant 0 : i32
    return %c0_i32, %arg0 : i32, i32
  }
  func.func @transform_2(%arg0: i32, %arg1: i32) -> (i32, i32) {
    %c0_i32 = arith.constant 0 : i32
    return %arg1, %arg0 : i32, i32
  }
}

</mosaic_0001>

<bundles_post_ra>
// kernel: tpu_custom_call.1
= control target key start
LH: loop header
LB: loop body
LE: loop exit
PB: predicated region body
PF: predicated region fallthrough
CT: control target
= control target key end

     0   :  { %7 = vsyncpa [#allocation3], 0  ;;  %s142_s0 = inlined_call_operand.hbm [shape: f32[2,288], index: 0, kind: input, shape index: {}, may-alias: {0,2}]   ;;  %s143_s1 = inlined_call_operand.vmem [shape: f32[1,288], index: 1, kind: input, shape index: {}]   ;;  %s144_s2 = inlined_call_operand.hbm [shape: f32[2,288], index: 2, kind: output, shape index: {}, may-alias: {0,2}]  }
   0x1   :  { %8 = vsyncpa [#allocation4], 0  ;;  %s14_s11 = sshll.u32 %s142_s0, 4  ;;  %s116_s12 = smov [#allocation2]   ;;  %s15_s11 = int_to_ptr.hbm [resolvable:$true] %s14_s11 }
   0x2   :  { %s16_s13 = sshll.u32 %s116_s12, 4  ;;  %s17_s13 = int_to_ptr.vmem [resolvable:$true] %s16_s13 }
   0x3   :  { %19 = dma.hbm_to_vmem [thread:$0]  %s15_s11, 96, %s17_s13, [#allocation3]  }
   0x4   :  { %112 = dma.done.wait [#allocation3], 96  }
   0x5   :  { %113 = vsyncadd [#allocation3], 4294967200  ;;  %v27_v0 = vld [vmem:[%s143_s1] sm:$0x7]  ;;  %vm40_vm0 = vcmask 1043458   ;;  %vm34_vm1 = vcmask 1041408  }
   0x6   :  { %v29_v1 = vperm.slane %v27_v0, 0  ;;  %v30_v2 = vperm.slane %v27_v0, 1  ;;  %v31_v3 = vperm.slane %v27_v0, 2  ;;  %vm36_vm2 = vcmask 1043456   ;;  %vm41_vm3 = vmor %vm40_vm0, %vm34_vm1  ;;  %v26_v6 = vld [vmem:[#allocation2] sm:$0x3f] }
   0x7   :  { %vm42_vm4 = vcmask 259076   ;;  %s117_s0 = smov [#allocation5]   ;;  %s52_s19 = sshll.u32 %s144_s2, 4  ;;  %s53_s19 = int_to_ptr.hbm [resolvable:$true] %s52_s19 }
   0x8   :  { %v32_v4 = vrot.slane %v30_v2, 6  ;;  %v33_v5 = vrot.slane %v31_v3, 4  ;;  %s50_s16 = sshll.u32 %s117_s0, 4  ;;  %vm43_vm5 = vmor %vm42_vm4, %vm41_vm3  ;;  %s51_s16 = int_to_ptr.vmem [resolvable:$true] %s50_s16 }
   0xa   :  { %v35_v7 = vsel %vm34_vm1, %v29_v1, %v32_v4 }
   0xb   :  { %v37_v8 = vsel %vm36_vm2, %v35_v7, %v33_v5 }
   0xc   :  { %v39_v9 = vadd.f32 %v37_v8, %v26_v6 }
   0xe   :  { %44 = vst.msk [vmem:[#allocation5] sm:$0x3f] %vm43_vm5, %v39_v9 }
   0xf   :  { %55 = dma.vmem_to_hbm [thread:$0]  %s51_s16, 96, %s53_s19, [#allocation4]  }
  0x10   :  { %114 = dma.done.wait [#allocation4], 96  }
  0x11   :  { %115 = vsyncadd [#allocation4], 4294967200 }
  0x12   :  { %60 = vsyncpa [#allocation3], 1 }
  0x13   :  { %61 = vsyncpa [#allocation4], 1 }

</bundles_post_ra>
